<compile_context>
chip_gen: v5e
topology: v5e:2x2
jax: 0.10.0
libtpu: 0.0.40
codegen_flags: <defaults>
</compile_context>

<pallas_src>
import jax
import jax.numpy as jnp
from jax import lax
from jax.experimental import pallas as pl
from jax.experimental.pallas import tpu as pltpu

BN_EPS = 1e-5
LANE = 128  # lane-dense feature padding (128 is enough; see review note on v6e)


def _round_up(n, m):
    return ((n + m - 1) // m) * m


def _cdiv(a, b):
    return -(-a // b)


def _pad2d(a, rows, cols):
    pr, pc = rows - a.shape[0], cols - a.shape[1]
    if pr == 0 and pc == 0:
        return a
    return jnp.pad(a, ((0, pr), (0, pc)))


# --------------------------------------------------------------------------
# Hardware-derived budgets / feature probes
# --------------------------------------------------------------------------
def _vmem_budget_bytes():
    """~75% of per-core VMEM: 96 MiB on v5e/v6e (128 MiB physical), 48 MiB on
    v7x (64 MiB physical).  Falls back to a conservative v7x-sized budget."""
    try:
        cap = int(pltpu.get_tpu_info().vmem_capacity_bytes)
    except Exception:  # query unavailable -> assume the smallest generation
        cap = 64 * 1024 * 1024
    cap = max(32 * 1024 * 1024, min(cap, 128 * 1024 * 1024))
    return (cap * 3) // 4


_BUFFERED1 = None


def _buffered1_supported():
    """Probe (once) whether pipeline_mode=pl.Buffered(1) lowers cleanly."""
    global _BUFFERED1
    if _BUFFERED1 is None:
        def _probe_kernel(x_ref, o_ref):
            o_ref[...] = x_ref[...]

        try:
            out = pl.pallas_call(
                _probe_kernel,
                out_shape=jax.ShapeDtypeStruct((8, 128), jnp.float32),
                grid=(1,),
                in_specs=[pl.BlockSpec((8, 128), lambda i: (0, 0),
                                       pipeline_mode=pl.Buffered(1))],
                out_specs=pl.BlockSpec((8, 128), lambda i: (0, 0)),
            )(jnp.zeros((8, 128), jnp.float32))
            jax.block_until_ready(out)
            _BUFFERED1 = True
        except Exception:
            _BUFFERED1 = False
    return _BUFFERED1


def _resident_spec(block_shape):
    """Grid-resident (constant index_map) weight block.  Single-buffered when
    supported so the big weight tile does not get double-buffered in VMEM."""
    idx = lambda *_: (0,) * len(block_shape)
    if _buffered1_supported():
        return pl.BlockSpec(block_shape, idx, pipeline_mode=pl.Buffered(1))
    return pl.BlockSpec(block_shape, idx)


# --------------------------------------------------------------------------
# Fused single-call fast path: whole MLP with h kept on-chip.
# --------------------------------------------------------------------------
def _make_fused_kernel(batch_size):
    inv_b = 1.0 / float(batch_size)

    def kernel(x_ref, w1_ref, gamma_ref, beta_ref, w2_ref, b2_ref, o_ref):
        h = jnp.dot(x_ref[...], w1_ref[...], preferred_element_type=jnp.float32)
        # Training-mode BN stats over the real batch rows (padded rows are 0).
        bsum = jnp.sum(h, axis=0, keepdims=True)
        bsumsq = jnp.sum(h * h, axis=0, keepdims=True)
        mean = bsum * inv_b
        var = jnp.maximum(bsumsq * inv_b - mean * mean, 0.0)
        inv_std = lax.rsqrt(var + BN_EPS)
        scale = gamma_ref[...] * inv_std
        shift = beta_ref[...] - mean * scale
        a = jnp.maximum(h * scale + shift, 0.0)
        o_ref[...] = (
            jnp.dot(a.astype(jnp.bfloat16), w2_ref[...],
                    preferred_element_type=jnp.float32) + b2_ref[...]
        ).astype(o_ref.dtype)

    return kernel


# --------------------------------------------------------------------------
# Kernel A: h = x @ w1 (bf16 operands, fp32 accum), bf16 writeback, fp32 stats.
# --------------------------------------------------------------------------
def _fc1_stats_kernel(x_ref, w1_ref, h_ref, sum_ref, sumsq_ref):
    h = jnp.dot(x_ref[...], w1_ref[...], preferred_element_type=jnp.float32)
    h_ref[...] = h.astype(jnp.bfloat16)  # halved HBM writeback / re-read bytes
    # Partial BN statistics from the fp32 accumulator (exact).
    sum_ref[...] = jnp.sum(h, axis=0, keepdims=True)[None]
    sumsq_ref[...] = jnp.sum(h * h, axis=0, keepdims=True)[None]


# --------------------------------------------------------------------------
# Kernel B: reduce partial stats -> folded BN affine -> ReLU -> Linear2.
# --------------------------------------------------------------------------
def _make_bn_relu_fc2_kernel(batch_size):
    inv_b = 1.0 / float(batch_size)

    def kernel(h_ref, psum_ref, psumsq_ref, gamma_ref, beta_ref,
               w2_ref, b2_ref, o_ref):
        # Full-batch statistics from per-tile partials (tiny fp32 VPU work).
        bsum = jnp.sum(psum_ref[...], axis=0)      # (1, d_hid_p)
        bsumsq = jnp.sum(psumsq_ref[...], axis=0)  # (1, d_hid_p)
        mean = bsum * inv_b
        var = jnp.maximum(bsumsq * inv_b - mean * mean, 0.0)
        inv_std = lax.rsqrt(var + BN_EPS)
        scale = gamma_ref[...] * inv_std
        shift = beta_ref[...] - mean * scale
        a = jnp.maximum(h_ref[...].astype(jnp.float32) * scale + shift, 0.0)
        o_ref[...] = (
            jnp.dot(a.astype(jnp.bfloat16), w2_ref[...],
                    preferred_element_type=jnp.float32) + b2_ref[...]
        ).astype(o_ref.dtype)

    return kernel


def mlp_forward(x, w1, b1, gamma, beta, w2, b2, *,
                force_two_pass=False, tile_b_override=None):
    """x: [B, d_in]; w1: [d_in, d_hid]; b1/gamma/beta: [1, d_hid];
    w2: [d_hid, d_out]; b2: [1, d_out]. Returns [B, d_out] float32.

    b1 is accepted for interface parity with nn.Linear(bias=True) but is not
    used: a per-feature bias before training-mode BatchNorm cancels exactly in
    the batch-mean centering, so it never reaches the output."""
    del b1  # mathematically dead under training-mode BatchNorm

    B, d_in = x.shape
    d_hid = w1.shape[1]
    d_out = w2.shape[1]

    d_in_p = _round_up(d_in, LANE)
    d_hid_p = _round_up(d_hid, LANE)
    d_out_p = _round_up(d_out, LANE)
    b16 = _round_up(B, 16)  # bf16 sublane packing

    vmem_budget = _vmem_budget_bytes()

    # Padded bf16 operands (half the HBM->VMEM DMA bytes for the matmuls).
    w1_p = _pad2d(w1, d_in_p, d_hid_p).astype(jnp.bfloat16)
    w2_p = _pad2d(w2, d_hid_p, d_out_p).astype(jnp.bfloat16)
    gamma_p = _pad2d(gamma, 1, d_hid_p).astype(jnp.float32)
    beta_p = _pad2d(beta, 1, d_hid_p).astype(jnp.float32)
    b2_p = _pad2d(b2, 1, d_out_p).astype(jnp.float32)

    # ---------------- small-problem fast path: single fused call ----------------
    fused_bytes = (b16 * d_in_p * 2 + d_in_p * d_hid_p * 2
                   + d_hid_p * d_out_p * 2
                   + 2 * b16 * d_hid_p * 4          # fp32 h + activation working set
                   + b16 * d_out_p * 4
                   + 3 * d_hid_p * 4 + 2 * d_out_p * 4)
    if (not force_two_pass) and (2 * fused_bytes <= vmem_budget):
        x_p = _pad2d(x, b16, d_in_p).astype(jnp.bfloat16)
        cost = pl.CostEstimate(
            flops=2 * b16 * d_hid_p * (d_in_p + d_out_p),
            transcendentals=d_hid_p,
            bytes_accessed=(b16 * d_in_p * 2 + d_in_p * d_hid_p * 2
                            + d_hid_p * d_out_p * 2 + b16 * d_out_p * 4
                            + 2 * d_hid_p * 4 + d_out_p * 4))
        out_pad = pl.pallas_call(
            _make_fused_kernel(B),
            out_shape=jax.ShapeDtypeStruct((b16, d_out_p), jnp.float32),
            grid=(1,),
            in_specs=[
                pl.BlockSpec((b16, d_in_p), lambda i: (0, 0)),
                pl.BlockSpec((d_in_p, d_hid_p), lambda i: (0, 0)),
                pl.BlockSpec((1, d_hid_p), lambda i: (0, 0)),
                pl.BlockSpec((1, d_hid_p), lambda i: (0, 0)),
                pl.BlockSpec((d_hid_p, d_out_p), lambda i: (0, 0)),
                pl.BlockSpec((1, d_out_p), lambda i: (0, 0)),
            ],
            out_specs=pl.BlockSpec((b16, d_out_p), lambda i: (0, 0)),
            compiler_params=pltpu.CompilerParams(
                dimension_semantics=("arbitrary",),
                vmem_limit_bytes=vmem_budget),
            cost_estimate=cost,
        )(x_p, w1_p, gamma_p, beta_p, w2_p, b2_p)
        return out_pad[:B, :d_out]

    # ---------------- two-pass batch-tiled path ----------------
    # VMEM-derived tile_b: resident weights (1 or 2 buffers) + double-buffered
    # batch tiles must fit the generation-specific budget.
    w_bufs = 1 if _buffered1_supported() else 2
    per_row_a = 2 * (d_in_p * 2 + d_hid_p * 2)   # x(bf16) + h(bf16), double-buffered
    per_row_b = 2 * (d_hid_p * 2 + d_out_p * 4)  # h(bf16) + out(fp32), double-buffered
    fixed_a = w_bufs * d_in_p * d_hid_p * 2
    fixed_b = w_bufs * d_hid_p * d_out_p * 2
    avail = vmem_budget - max(fixed_a, fixed_b) - (2 << 20)  # slack for small operands
    # TODO(synk): if `avail` goes negative (weights alone exceed the VMEM budget,
    # e.g. very large d_in on v7x), add a K grid axis with an fp32 accumulator
    # scratch instead of shrinking tile_b below 256.
    if tile_b_override is not None:
        tile_b_target = max(16, _round_up(int(tile_b_override), 16))
    else:
        tile_b_target = avail // max(per_row_a, per_row_b)
        tile_b_target = max(16, min(1024, (tile_b_target // 16) * 16))

    nbt = _cdiv(b16, tile_b_target)
    tile_b = _round_up(_cdiv(b16, nbt), 16)   # overshoot < nbt*16 rows
    b_pad = nbt * tile_b

    x_p = _pad2d(x, b_pad, d_in_p).astype(jnp.bfloat16)

    cparams = pltpu.CompilerParams(
        dimension_semantics=("parallel",),     # shard batch tiles across TCs
        vmem_limit_bytes=vmem_budget,
    )

    # ---- pass 1: Linear1 + partial BN statistics ----
    cost_a = pl.CostEstimate(
        flops=2 * b_pad * d_in_p * d_hid_p,
        transcendentals=0,
        bytes_accessed=(b_pad * d_in_p * 2 + d_in_p * d_hid_p * 2
                        + b_pad * d_hid_p * 2 + 2 * nbt * d_hid_p * 4))
    h_pad, psum, psumsq = pl.pallas_call(
        _fc1_stats_kernel,
        out_shape=(
            jax.ShapeDtypeStruct((b_pad, d_hid_p), jnp.bfloat16),
            jax.ShapeDtypeStruct((nbt, 1, d_hid_p), jnp.float32),
            jax.ShapeDtypeStruct((nbt, 1, d_hid_p), jnp.float32),
        ),
        grid=(nbt,),
        in_specs=[
            pl.BlockSpec((tile_b, d_in_p), lambda i: (i, 0)),
            _resident_spec((d_in_p, d_hid_p)),          # resident w1
        ],
        out_specs=(
            pl.BlockSpec((tile_b, d_hid_p), lambda i: (i, 0)),
            pl.BlockSpec((1, 1, d_hid_p), lambda i: (i, 0, 0)),
            pl.BlockSpec((1, 1, d_hid_p), lambda i: (i, 0, 0)),
        ),
        compiler_params=cparams,
        cost_estimate=cost_a,
    )(x_p, w1_p)

    # ---- pass 2: in-kernel stats reduce + folded BN + ReLU + Linear2 ----
    cost_b = pl.CostEstimate(
        flops=2 * b_pad * d_hid_p * d_out_p + 4 * b_pad * d_hid_p,
        transcendentals=nbt * d_hid_p,
        bytes_accessed=(b_pad * d_hid_p * 2 + 2 * nbt * d_hid_p * 4
                        + 2 * d_hid_p * 4 + d_hid_p * d_out_p * 2
                        + d_out_p * 4 + b_pad * d_out_p * 4))
    out_pad = pl.pallas_call(
        _make_bn_relu_fc2_kernel(B),
        out_shape=jax.ShapeDtypeStruct((b_pad, d_out_p), jnp.float32),
        grid=(nbt,),
        in_specs=[
            pl.BlockSpec((tile_b, d_hid_p), lambda i: (i, 0)),
            pl.BlockSpec((nbt, 1, d_hid_p), lambda i: (0, 0, 0)),
            pl.BlockSpec((nbt, 1, d_hid_p), lambda i: (0, 0, 0)),
            pl.BlockSpec((1, d_hid_p), lambda i: (0, 0)),
            pl.BlockSpec((1, d_hid_p), lambda i: (0, 0)),
            _resident_spec((d_hid_p, d_out_p)),          # resident w2
            pl.BlockSpec((1, d_out_p), lambda i: (0, 0)),
        ],
        out_specs=pl.BlockSpec((tile_b, d_out_p), lambda i: (i, 0)),
        compiler_params=cparams,
        cost_estimate=cost_b,
    )(h_pad, psum, psumsq, gamma_p, beta_p, w2_p, b2_p)

    return out_pad[:B, :d_out]


def init_params(key, d_input, d_hidden, d_output):
    """PyTorch nn.Linear default init (U(-1/sqrt(fan_in), 1/sqrt(fan_in))) and
    BatchNorm1d defaults (gamma=1, beta=0)."""
    k1, k2, k3, k4 = jax.random.split(key, 4)
    bound1 = 1.0 / (d_input ** 0.5)
    bound2 = 1.0 / (d_hidden ** 0.5)
    w1 = jax.random.uniform(k1, (d_input, d_hidden), jnp.float32, -bound1, bound1)
    b1 = jax.random.uniform(k2, (1, d_hidden), jnp.float32, -bound1, bound1)
    gamma = jnp.ones((1, d_hidden), jnp.float32)
    beta = jnp.zeros((1, d_hidden), jnp.float32)
    w2 = jax.random.uniform(k3, (d_hidden, d_output), jnp.float32, -bound2, bound2)
    b2 = jax.random.uniform(k4, (1, d_output), jnp.float32, -bound2, bound2)
    return w1, b1, gamma, beta, w2, b2


def mlp_reference_exact(x, w1, b1, gamma, beta, w2, b2):
    """Pure fp32 reference with exact PyTorch semantics (including b1)."""
    h = x @ w1 + b1
    mean = jnp.mean(h, axis=0, keepdims=True)
    var = jnp.mean((h - mean) ** 2, axis=0, keepdims=True)
    h = (h - mean) * lax.rsqrt(var + BN_EPS) * gamma + beta
    h = jnp.maximum(h, 0.0)
    return h @ w2 + b2


def mlp_reference_bf16(x, w1, gamma, beta, w2, b2, *, round_h):
    """Reference mimicking the kernel's numerics (bf16 MXU operands, fp32 accum/BN;
    round_h=True additionally rounds h to bf16, matching the two-pass path)."""
    B = x.shape[0]
    h = jnp.dot(x.astype(jnp.bfloat16), w1.astype(jnp.bfloat16),
                preferred_element_type=jnp.float32)
    mean = jnp.sum(h, axis=0) / B
    var = jnp.maximum(jnp.sum(h * h, axis=0) / B - mean * mean, 0.0)
    scale = gamma[0] * lax.rsqrt(var + BN_EPS)
    shift = beta[0] - mean * scale
    if round_h:
        h = h.astype(jnp.bfloat16).astype(jnp.float32)
    a = jnp.maximum(h * scale + shift, 0.0)
    return jnp.dot(a.astype(jnp.bfloat16), w2.astype(jnp.bfloat16),
                   preferred_element_type=jnp.float32) + b2


if __name__ == "__main__":
    _buffered1_supported()  # warm the probe eagerly (outside jit)

    fwd = jax.jit(mlp_forward, static_argnames=("force_two_pass", "tile_b_override"))

    # ---- small case: exercises the fused single-kernel fast path ----
    B, d_input, d_hidden, d_output = 8, 32, 64, 16
    key = jax.random.PRNGKey(0)
    kx, kp = jax.random.split(key)
    x = jax.random.normal(kx, (B, d_input), jnp.float32)
    params = init_params(kp, d_input, d_hidden, d_output)
    w1, b1, gamma, beta, w2, b2 = params

    out = jax.block_until_ready(fwd(x, *params))
    assert out.shape == (B, d_output)
    ref_t = mlp_reference_bf16(x, w1, gamma, beta, w2, b2, round_h=False)
    ref_e = mlp_reference_exact(x, *params)
    assert jnp.allclose(out, ref_t, atol=3e-3, rtol=3e-3), "fused: mismatch vs bf16-mimic ref"
    assert jnp.allclose(out, ref_e, atol=3e-2, rtol=3e-2), "fused: mismatch vs fp32 exact ref"

    # ---- forced two-pass (batch-tiled) path with several batch tiles ----
    B2, d_in2, d_hid2, d_out2 = 48, 64, 128, 32
    kx2, kp2 = jax.random.split(jax.random.PRNGKey(1))
    x2 = jax.random.normal(kx2, (B2, d_in2), jnp.float32)
    params2 = init_params(kp2, d_in2, d_hid2, d_out2)
    w1b, b1b, gammab, betab, w2b, b2b = params2

    out2 = jax.block_until_ready(
        fwd(x2, *params2, force_two_pass=True, tile_b_override=16))
    assert out2.shape == (B2, d_out2)
    ref2_t = mlp_reference_bf16(x2, w1b, gammab, betab, w2b, b2b, round_h=True)
    ref2_e = mlp_reference_exact(x2, *params2)
    assert jnp.allclose(out2, ref2_t, atol=3e-3, rtol=3e-3), "two-pass: mismatch vs bf16-mimic ref"
    assert jnp.allclose(out2, ref2_e, atol=8e-2, rtol=5e-2), "two-pass: mismatch vs fp32 exact ref"

    print("KERNEL_OK")
</pallas_src>

<mosaic_0001>
module attributes {stable_mosaic.version = 11 : i64} {
  func.func @_probe_kernel(%arg0: i32, %arg1: memref<8x128xf32, #tpu.memory_space<vmem>>, %arg2: memref<8x128xf32, #tpu.memory_space<vmem>>) attributes {dimension_semantics = [#tpu.dimension_semantics<arbitrary>], iteration_bounds = array<i64: 1>, scalar_prefetch = 0 : i64, scratch_operands = 0 : i64, tpu.core_type = #tpu.core_type<tc>, window_params = [{pipeline_mode = #tpu.pipeline_mode<synchronous>, transform_indices = @transform_0, window_bounds = array<i64: 8, 128>}, {pipeline_mode = #tpu.pipeline_mode<synchronous>, transform_indices = @transform_1, window_bounds = array<i64: 8, 128>}]} {
    %c0 = arith.constant 0 : index
    %c0_0 = arith.constant 0 : index
    %0 = vector.load %arg1[%c0, %c0_0] : memref<8x128xf32, #tpu.memory_space<vmem>>, vector<8x128xf32>
    %c0_1 = arith.constant 0 : index
    %c0_2 = arith.constant 0 : index
    %1 = vector.load %arg2[%c0_1, %c0_2] : memref<8x128xf32, #tpu.memory_space<vmem>>, vector<8x128xf32>
    tpu.vector_store %arg2[%c0_1, %c0_2], %0 {strides = array<i32>} : memref<8x128xf32, #tpu.memory_space<vmem>>, vector<8x128xf32>,
    return
  }
  func.func @transform_0(%arg0: i32) -> (i32, i32) {
    %c0_i32 = arith.constant 0 : i32
    %c0_i32_0 = arith.constant 0 : i32
    %c0_i32_1 = arith.constant 0 : i32
    return %c0_i32, %c0_i32_0 : i32, i32
  }
  func.func @transform_1(%arg0: i32) -> (i32, i32) {
    %c0_i32 = arith.constant 0 : i32
    %c0_i32_0 = arith.constant 0 : i32
    %c0_i32_1 = arith.constant 0 : i32
    return %c0_i32, %c0_i32_0 : i32, i32
  }
}

module attributes {stable_mosaic.version = 11 : i64} {
  func.func @kernel(%arg0: i32, %arg1: memref<16x128xbf16, #tpu.memory_space<vmem>>, %arg2: memref<128x128xbf16, #tpu.memory_space<vmem>>, %arg3: memref<1x128xf32, #tpu.memory_space<vmem>>, %arg4: memref<1x128xf32, #tpu.memory_space<vmem>>, %arg5: memref<128x128xbf16, #tpu.memory_space<vmem>>, %arg6: memref<1x128xf32, #tpu.memory_space<vmem>>, %arg7: memref<16x128xf32, #tpu.memory_space<vmem>>) attributes {dimension_semantics = [#tpu.dimension_semantics<arbitrary>], iteration_bounds = array<i64: 1>, scalar_prefetch = 0 : i64, scratch_operands = 0 : i64, tpu.core_type = #tpu.core_type<tc>, window_params = [{pipeline_mode = #tpu.pipeline_mode<synchronous>, transform_indices = @transform_0, window_bounds = array<i64: 16, 128>}, {pipeline_mode = #tpu.pipeline_mode<synchronous>, transform_indices = @transform_1, window_bounds = array<i64: 128, 128>}, {pipeline_mode = #tpu.pipeline_mode<synchronous>, transform_indices = @transform_2, window_bounds = array<i64: 1, 128>}, {pipeline_mode = #tpu.pipeline_mode<synchronous>, transform_indices = @transform_3, window_bounds = array<i64: 1, 128>}, {pipeline_mode = #tpu.pipeline_mode<synchronous>, transform_indices = @transform_4, window_bounds = array<i64: 128, 128>}, {pipeline_mode = #tpu.pipeline_mode<synchronous>, transform_indices = @transform_5, window_bounds = array<i64: 1, 128>}, {pipeline_mode = #tpu.pipeline_mode<synchronous>, transform_indices = @transform_6, window_bounds = array<i64: 16, 128>}]} {
    %c0 = arith.constant 0 : index
    %c0_0 = arith.constant 0 : index
    %0 = vector.load %arg1[%c0, %c0_0] : memref<16x128xbf16, #tpu.memory_space<vmem>>, vector<16x128xbf16>
    %c0_1 = arith.constant 0 : index
    %c0_2 = arith.constant 0 : index
    %1 = vector.load %arg2[%c0_1, %c0_2] : memref<128x128xbf16, #tpu.memory_space<vmem>>, vector<128x128xbf16>
    %cst = arith.constant dense<0.000000e+00> : vector<16x128xf32>
    %2 = tpu.matmul %0, %1, %cst {dimension_numbers = #tpu.dot_dimension_numbers<[1], [0], [0], [1], [0, 0, 1, 1], [], []>} : vector<16x128xbf16>, vector<128x128xbf16>, vector<16x128xf32> -> vector<16x128xf32>
    %cst_3 = arith.constant dense<0.000000e+00> : vector<128xf32>
    %3 = vector.multi_reduction <add>, %2, %cst_3 [0] : vector<16x128xf32> to vector<128xf32>
    %4 = vector.shape_cast %3 : vector<128xf32> to vector<1x128xf32>
    %5 = arith.mulf %2, %2 : vector<16x128xf32>
    %cst_4 = arith.constant dense<0.000000e+00> : vector<128xf32>
    %6 = vector.multi_reduction <add>, %5, %cst_4 [0] : vector<16x128xf32> to vector<128xf32>
    %7 = vector.shape_cast %6 : vector<128xf32> to vector<1x128xf32>
    %cst_5 = arith.constant 1.250000e-01 : f32
    %8 = vector.broadcast %cst_5 : f32 to vector<1x128xf32>
    %9 = arith.mulf %4, %8 : vector<1x128xf32>
    %cst_6 = arith.constant 1.250000e-01 : f32
    %10 = vector.broadcast %cst_6 : f32 to vector<1x128xf32>
    %11 = arith.mulf %7, %10 : vector<1x128xf32>
    %12 = arith.mulf %9, %9 : vector<1x128xf32>
    %13 = arith.subf %11, %12 : vector<1x128xf32>
    %cst_7 = arith.constant 0.000000e+00 : f32
    %14 = vector.broadcast %cst_7 : f32 to vector<1x128xf32>
    %15 = arith.maximumf %13, %14 : vector<1x128xf32>
    %cst_8 = arith.constant 9.99999974E-6 : f32
    %16 = vector.broadcast %cst_8 : f32 to vector<1x128xf32>
    %17 = arith.addf %15, %16 : vector<1x128xf32>
    %18 = math.rsqrt %17 : vector<1x128xf32>
    %c0_9 = arith.constant 0 : index
    %c0_10 = arith.constant 0 : index
    %19 = vector.load %arg3[%c0_9, %c0_10] : memref<1x128xf32, #tpu.memory_space<vmem>>, vector<1x128xf32>
    %20 = arith.mulf %19, %18 : vector<1x128xf32>
    %c0_11 = arith.constant 0 : index
    %c0_12 = arith.constant 0 : index
    %21 = vector.load %arg4[%c0_11, %c0_12] : memref<1x128xf32, #tpu.memory_space<vmem>>, vector<1x128xf32>
    %22 = arith.mulf %9, %20 : vector<1x128xf32>
    %23 = arith.subf %21, %22 : vector<1x128xf32>
    %24 = vector.broadcast %20 : vector<1x128xf32> to vector<16x128xf32>
    %25 = arith.mulf %2, %24 : vector<16x128xf32>
    %26 = vector.broadcast %23 : vector<1x128xf32> to vector<16x128xf32>
    %27 = arith.addf %25, %26 : vector<16x128xf32>
    %cst_13 = arith.constant 0.000000e+00 : f32
    %28 = vector.broadcast %cst_13 : f32 to vector<16x128xf32>
    %29 = arith.maximumf %27, %28 : vector<16x128xf32>
    %30 = arith.truncf %29 : vector<16x128xf32> to vector<16x128xbf16>
    %c0_14 = arith.constant 0 : index
    %c0_15 = arith.constant 0 : index
    %31 = vector.load %arg5[%c0_14, %c0_15] : memref<128x128xbf16, #tpu.memory_space<vmem>>, vector<128x128xbf16>
    %cst_16 = arith.constant dense<0.000000e+00> : vector<16x128xf32>
    %32 = tpu.matmul %30, %31, %cst_16 {dimension_numbers = #tpu.dot_dimension_numbers<[1], [0], [0], [1], [0, 0, 1, 1], [], []>} : vector<16x128xbf16>, vector<128x128xbf16>, vector<16x128xf32> -> vector<16x128xf32>
    %c0_17 = arith.constant 0 : index
    %c0_18 = arith.constant 0 : index
    %33 = vector.load %arg6[%c0_17, %c0_18] : memref<1x128xf32, #tpu.memory_space<vmem>>, vector<1x128xf32>
    %34 = vector.broadcast %33 : vector<1x128xf32> to vector<16x128xf32>
    %35 = arith.addf %32, %34 : vector<16x128xf32>
    %c0_19 = arith.constant 0 : index
    %c0_20 = arith.constant 0 : index
    %36 = vector.load %arg7[%c0_19, %c0_20] : memref<16x128xf32, #tpu.memory_space<vmem>>, vector<16x128xf32>
    tpu.vector_store %arg7[%c0_19, %c0_20], %35 {strides = array<i32>} : memref<16x128xf32, #tpu.memory_space<vmem>>, vector<16x128xf32>,
    return
  }
  func.func @transform_0(%arg0: i32) -> (i32, i32) {
    %c0_i32 = arith.constant 0 : i32
    %c0_i32_0 = arith.constant 0 : i32
    %c0_i32_1 = arith.constant 0 : i32
    return %c0_i32, %c0_i32_0 : i32, i32
  }
  func.func @transform_1(%arg0: i32) -> (i32, i32) {
    %c0_i32 = arith.constant 0 : i32
    %c0_i32_0 = arith.constant 0 : i32
    %c0_i32_1 = arith.constant 0 : i32
    return %c0_i32, %c0_i32_0 : i32, i32
  }
  func.func @transform_2(%arg0: i32) -> (i32, i32) {
    %c0_i32 = arith.constant 0 : i32
    %c0_i32_0 = arith.constant 0 : i32
    %c0_i32_1 = arith.constant 0 : i32
    return %c0_i32, %c0_i32_0 : i32, i32
  }
  func.func @transform_3(%arg0: i32) -> (i32, i32) {
    %c0_i32 = arith.constant 0 : i32
    %c0_i32_0 = arith.constant 0 : i32
    %c0_i32_1 = arith.constant 0 : i32
    return %c0_i32, %c0_i32_0 : i32, i32
  }
  func.func @transform_4(%arg0: i32) -> (i32, i32) {
    %c0_i32 = arith.constant 0 : i32
    %c0_i32_0 = arith.constant 0 : i32
    %c0_i32_1 = arith.constant 0 : i32
    return %c0_i32, %c0_i32_0 : i32, i32
  }
  func.func @transform_5(%arg0: i32) -> (i32, i32) {
    %c0_i32 = arith.constant 0 : i32
    %c0_i32_0 = arith.constant 0 : i32
    %c0_i32_1 = arith.constant 0 : i32
    return %c0_i32, %c0_i32_0 : i32, i32
  }
  func.func @transform_6(%arg0: i32) -> (i32, i32) {
    %c0_i32 = arith.constant 0 : i32
    %c0_i32_0 = arith.constant 0 : i32
    %c0_i32_1 = arith.constant 0 : i32
    return %c0_i32, %c0_i32_0 : i32, i32
  }
}

</mosaic_0001>

<bundles_post_ra>
// kernel: tpu_custom_call.1
= control target key start
LH: loop header
LB: loop body
LE: loop exit
PB: predicated region body
PF: predicated region fallthrough
CT: control target
= control target key end

     0   :  { %6 = vsyncpa [#allocation3], 0  ;;  %s114_s0 = inlined_call_operand.hbm [shape: f32[8,128], index: 0, kind: input, shape index: {}]   ;;  %s115_s1 = inlined_call_operand.hbm [shape: f32[8,128], index: 1, kind: output, shape index: {}]  }
   0x1   :  { %7 = vsyncpa [#allocation4], 0  ;;  %s13_s8 = sshll.u32 %s114_s0, 4  ;;  %s96_s9 = smov [#allocation2]   ;;  %s14_s8 = int_to_ptr.hbm [resolvable:$true] %s13_s8 }
   0x2   :  { %s15_s10 = sshll.u32 %s96_s9, 4  ;;  %s16_s10 = int_to_ptr.vmem [resolvable:$true] %s15_s10 }
   0x3   :  { %18 = dma.hbm_to_vmem [thread:$0]  %s14_s8, 128, %s16_s10, [#allocation3]  }
   0x4   :  { %92 = dma.done.wait [#allocation3], 128  }
   0x5   :  { %93 = vsyncadd [#allocation3], 4294967168  ;;  %s97_s11 = smov [#allocation5]   ;;  %s32_s15 = sshll.u32 %s115_s1, 4  ;;  %v23_v0 = vld [vmem:[#allocation2] sm:$0xff]  ;;  %s33_s15 = int_to_ptr.hbm [resolvable:$true] %s32_s15 }
   0x6   :  { %s30_s12 = sshll.u32 %s97_s11, 4  ;;  %24 = vst [vmem:[#allocation5] sm:$0xff] %v23_v0  ;;  %s31_s12 = int_to_ptr.vmem [resolvable:$true] %s30_s12 }
   0x7   :  { %35 = dma.vmem_to_hbm [thread:$0]  %s31_s12, 128, %s33_s15, [#allocation4]  }
   0x8   :  { %94 = dma.done.wait [#allocation4], 128  }
   0x9   :  { %95 = vsyncadd [#allocation4], 4294967168 }
   0xa   :  { %40 = vsyncpa [#allocation3], 1 }
   0xb   :  { %41 = vsyncpa [#allocation4], 1 }

// kernel: mlp_forward.1
= control target key start
LH: loop header
LB: loop body
LE: loop exit
PB: predicated region body
PF: predicated region fallthrough
CT: control target
= control target key end

     0   :  { %s436_s1 = inlined_call_operand.vmem [shape: bf16[128,128], index: 1, kind: input, shape index: {}]   ;;  %s437_s0 = inlined_call_operand.vmem [shape: bf16[16,128], index: 0, kind: input, shape index: {}]   ;;  %s438_s5 = inlined_call_operand.vmem [shape: f32[1,128], index: 5, kind: input, shape index: {}]   ;;  %s439_s4 = inlined_call_operand.vmem [shape: bf16[128,128], index: 4, kind: input, shape index: {}]   ;;  %s440_s2 = inlined_call_operand.vmem [shape: f32[1,128], index: 2, kind: input, shape index: {}]   ;;  %s441_s3 = inlined_call_operand.vmem [shape: f32[1,128], index: 3, kind: input, shape index: {}]   ;;  %s442_s6 = inlined_call_operand.vmem [shape: f32[16,128], index: 6, kind: output, shape index: {}]  }
   0x1   :  { %v323_v0 = vld [vmem:[%s436_s1 + $0x38] sm:$0xff]  ;;  %v322_v1 = vld [vmem:[%s436_s1 + $0x30] sm:$0xff]  ;;  %v321_v2 = vld [vmem:[%s436_s1 + $0x28] sm:$0xff] }
   0x2   :  { %95 = vmatpush.bf16.msra.mxu0 %v323_v0  ;;  %v320_v3 = vld [vmem:[%s436_s1 + $0x20] sm:$0xff]  ;;  %v319_v4 = vld [vmem:[%s436_s1 + $0x18] sm:$0xff]  ;;  %v318_v5 = vld [vmem:[%s436_s1 + $0x10] sm:$0xff] }
   0x3   :  { %v317_v6 = vld [vmem:[%s436_s1 + $0x8] sm:$0xff]  ;;  %v316_v7 = vld [vmem:[%s436_s1] sm:$0xff]  ;;  %v331_v10 = vld [vmem:[%s439_s4 + $0x38] sm:$0xff] }
   0x4   :  { %v315_v8 = vld [vmem:[%s437_s0] sm:$0xff]  ;;  %227 = vmatpush.bf16.msra.mxu1 %v331_v10  ;;  %v330_v11 = vld [vmem:[%s439_s4 + $0x30] sm:$0xff]  ;;  %v329_v13 = vld [vmem:[%s439_s4 + $0x28] sm:$0xff] }
   0x5   :  { %v328_v19 = vld [vmem:[%s439_s4 + $0x20] sm:$0xff]  ;;  %v327_v24 = vld [vmem:[%s439_s4 + $0x18] sm:$0xff]  ;;  %v326_v29 = vld [vmem:[%s439_s4 + $0x10] sm:$0xff] }
   0x6   :  { %96 = vmatpush.bf16.msra.mxu0 %v322_v1  ;;  %v325_v34 = vld [vmem:[%s439_s4 + $0x8] sm:$0xff]  ;;  %v324_v38 = vld [vmem:[%s439_s4] sm:$0xff] }
   0x7   :  { %v141_v47 = vld [vmem:[%s440_s2] sm:$0x1] }
   0x8   :  { %228 = vmatpush.bf16.msra.mxu1 %v330_v11  ;;  %v143_v50 = vld [vmem:[%s441_s3] sm:$0x1] }
   0x9   :  { %v332_v62 = vld [vmem:[%s438_s5] ss:$0 sm:$0xff] }
   0xa   :  { %97 = vmatpush.bf16.msra.mxu0 %v321_v2 }
   0xc   :  { %229 = vmatpush.bf16.msra.mxu1 %v329_v13 }
   0xe   :  { %98 = vmatpush.bf16.msra.mxu0 %v320_v3 }
  0x10   :  { %230 = vmatpush.bf16.msra.mxu1 %v328_v19 }
  0x12   :  { %99 = vmatpush.bf16.msra.mxu0 %v319_v4 }
  0x14   :  { %231 = vmatpush.bf16.msra.mxu1 %v327_v24 }
  0x16   :  { %100 = vmatpush.bf16.msra.mxu0 %v318_v5 }
  0x18   :  { %232 = vmatpush.bf16.msra.mxu1 %v326_v29 }
  0x1a   :  { %101 = vmatpush.bf16.msra.mxu0 %v317_v6 }
  0x1c   :  { %233 = vmatpush.bf16.msra.mxu1 %v325_v34 }
  0x1e   :  { %102 = vmatpush.bf16.msra.mxu0 %v316_v7 }
  0x20   :  { %234 = vmatpush.bf16.msra.mxu1 %v324_v38 }
  0x21   :  { %103 = vmatmul.bf16.vlgmr.msra.gmra.mxu0 %v315_v8 }
  0x9e   :  { %v104_v9 = vpop.f32.mrf.mxu0 }
  0x9f   :  { %v116_v14 = vmul.f32 %v104_v9, %v104_v9 }
  0xa6   :  { %v106_v12 = vpop.f32.mrf.mxu0 }
  0xa7   :  { %v109_v15 = vadd.f32 %v106_v12, %v104_v9  ;;  %v117_v16 = vmul.f32 %v106_v12, %v106_v12 }
  0xa9   :  { %v110_v17 = vrot.slane %v109_v15, 4  ;;  %v118_v18 = vadd.f32 %v117_v16, %v116_v14 }
  0xab   :  { %v111_v20 = vadd.f32 %v110_v17, %v109_v15  ;;  %v119_v21 = vrot.slane %v118_v18, 4 }
  0xad   :  { %v112_v22 = vrot.slane %v111_v20, 2  ;;  %v120_v23 = vadd.f32 %v119_v21, %v118_v18 }
  0xaf   :  { %v113_v25 = vadd.f32 %v112_v22, %v111_v20  ;;  %v121_v26 = vrot.slane %v120_v23, 2 }
  0xb1   :  { %v114_v27 = vrot.slane %v113_v25, 1  ;;  %v122_v28 = vadd.f32 %v121_v26, %v120_v23 }
  0xb3   :  { %v115_v30 = vadd.f32 %v114_v27, %v113_v25  ;;  %v123_v31 = vrot.slane %v122_v28, 1 }
  0xb5   :  { %v124_v32 = vadd.f32 %v123_v31, %v122_v28  ;;  %v125_v33 = vmul.f32 0.125, %v115_v30 }
  0xb7   :  { %v126_v35 = vmul.f32 0.125, %v124_v32  ;;  %v127_v36 = vmul.f32 %v125_v33, %v125_v33 }
  0xb9   :  { %v128_v37 = vsub.f32 %v126_v35, %v127_v36 }
  0xbb   :  { %v129_v39 = vmax.f32 %v128_v37, 0.0 }
  0xbd   :  { %v130_v40 = vadd.f32 1e-05, %v129_v39 }
  0xbf   :  { %333 = vrsqrt.f32 %v130_v40  ;;  %vm137_vm1 = vweird.f32 %v130_v40 }
  0xc5   :  { %v334_v41 = vpop.eup %333 }
  0xc6   :  { %v132_v42 = vmul.f32 %v334_v41, %v130_v40  ;;  %vm138_vm0 = vweird.f32 %v334_v41 }
  0xc7   :  { %vm139_vm2 = vmor %vm137_vm1, %vm138_vm0 }
  0xc8   :  { %v133_v43 = vmul.f32 %v334_v41, %v132_v42 }
  0xca   :  { %v134_v44 = vmul.f32 0.5, %v133_v43 }
  0xcc   :  { %v135_v45 = vsub.f32 1.5, %v134_v44 }
  0xce   :  { %v136_v46 = vmul.f32 %v334_v41, %v135_v45 }
  0xd0   :  { %v140_v48 = vsel %vm139_vm2, %v334_v41, %v136_v46 }
  0xd1   :  { %v142_v49 = vmul.f32 %v141_v47, %v140_v48 }
  0xd3   :  { %v144_v51 = vmul.f32 %v142_v49, %v125_v33  ;;  %v147_v52 = vperm.slane %v142_v49, 0 }
  0xd5   :  { %v145_v53 = vsub.f32 %v143_v50, %v144_v51  ;;  %v149_v54 = vmul.f32 %v147_v52, %v104_v9  ;;  %v150_v55 = vmul.f32 %v147_v52, %v106_v12 }
  0xd7   :  { %v152_v56 = vperm.slane %v145_v53, 0 }
  0xd9   :  { %v155_v57 = vadd.f32 %v152_v56, %v150_v55  ;;  %v154_v58 = vadd.f32 %v152_v56, %v149_v54 }
  0xdb   :  { %v156_v59 = vmax.f32 %v154_v58, 0.0  ;;  %v157_v60 = vmax.f32 %v155_v57, 0.0 }
  0xdd   :  { %v158_v61 = vpack.c.bf16 %v157_v60, %v156_v59 }
  0xdf   :  { %235 = vmatmul.bf16.vlgmr.msra.gmra.mxu1 %v158_v61 }
 0x15c   :  { %v236_v63 = vpop.f32.mrf.mxu1 }
 0x15d   :  { %v237_v0 = vadd.f32 %v332_v62, %v236_v63 }
 0x15f   :  { %241 = vst [vmem:[%s442_s6] sm:$0xff] %v237_v0 }
 0x164   :  { %v238_v1 = vpop.f32.mrf.mxu1 }
 0x165   :  { %v239_v2 = vadd.f32 %v332_v62, %v238_v1 }
 0x167   :  { %242 = vst [vmem:[%s442_s6 + $0x8] sm:$0xff] %v239_v2 }

</bundles_post_ra>
